<compile_context>
chip_gen: v7x
topology: tpu7x:2x2x1
jax: 0.10.0
libtpu: 0.0.40
codegen_flags: <defaults>
</compile_context>

<pallas_src>
import jax
import jax.numpy as jnp
from jax.experimental import pallas as pl
from jax.experimental.pallas import tpu as pltpu


def _round_up(x, m):
    return ((x + m - 1) // m) * m


def _tpu_core_info():
    """(tensorcores_per_chip, vmem_bytes_per_core), with conservative fallbacks."""
    n_cores, vmem = 1, 64 << 20
    try:
        info = pltpu.get_tpu_info()
        v = getattr(info, "vmem_capacity_bytes", None)
        if isinstance(v, int) and v > 0:
            vmem = v
        for attr in ("num_cores", "num_tensorcores", "tensorcore_count", "cores_per_chip"):
            c = getattr(info, attr, None)
            if isinstance(c, int) and c > 0:
                n_cores = c
                break
    except Exception:
        pass
    try:
        dk = jax.devices()[0].device_kind.lower()
        if "v7" in dk or "7x" in dk:
            n_cores = max(n_cores, 2)
    except Exception:
        pass
    return n_cores, vmem


# -----------------------------------------------------------------------------
# Fused kernel: acc += x @ W (K-tiled) ; last K step: tanh(acc+b) -> MXU regressor -> sigmoid
# -----------------------------------------------------------------------------
def _saliency_head_kernel(x_ref, w_ref, misc_ref, rw_ref, logits_ref, acc_ref):
    """
    x_ref      : [tm, tk]  bf16  CLS-embedding row tile (streamed over M and K)
    w_ref      : [Hp, Hp] or [tk, Hp] bf16  encoder dense weight (resident or K-streamed)
    misc_ref   : [2,  Hp]  f32   row 0 = encoder bias, row 1 = regressor bias replicated
    rw_ref     : [Hp, 128] bf16  regressor weight slab (reg_w in lane 0, zeros elsewhere)
    logits_ref : [tm, 128] f32   sigmoid output slab (logit in lane 0), lane-dense store
    acc_ref    : [tm, Hp]  f32   VMEM accumulator scratch for the K reduction
    """
    k = pl.program_id(1)

    @pl.when(k == 0)
    def _init():
        acc_ref[...] = jnp.zeros_like(acc_ref)

    # Encoder dense: bf16 operands on the MXU, f32 accumulation.
    acc_ref[...] += jnp.dot(x_ref[...], w_ref[...], preferred_element_type=jnp.float32)

    @pl.when(k == pl.num_programs(1) - 1)
    def _epilogue():
        h = jnp.tanh(acc_ref[...] + misc_ref[0:1, :])                    # f32 VPU add + EUP tanh
        # Regressor Linear(H,1): tiny extra MXU matmul (Hp x 128) instead of XLU lane reduction.
        z = jnp.dot(h.astype(jnp.bfloat16), rw_ref[...],
                    preferred_element_type=jnp.float32)                  # [tm, 128], logit in lane 0
        logits_ref[...] = jax.nn.sigmoid(z + misc_ref[1:2, 0:128])


def _fused_head(cls_emb_p, w_p, misc, rw_slab, *, k_tile_override=None):
    """cls_emb_p: [B, Hp] f32 (already lane-padded) -> logits [B] f32 via one fused Pallas kernel."""
    B, Hp = cls_emb_p.shape
    n_cores, vmem_total = _tpu_core_info()
    budget = (vmem_total * 3) // 4          # ~96 MiB on v5e/v6e, ~48 MiB on v7x

    # Row (sublane) padding + row-tile choice.  Only split rows when 2 TensorCores exist (v7x);
    # on single-TC v5e/v6e use the largest tile (bigger tiles -> closer to HBM roofline).
    M0 = _round_up(B, 8)
    if n_cores >= 2 and M0 >= 16:
        tm = min(512, _round_up(pl.cdiv(M0, n_cores), 8))
    else:
        tm = min(512, M0)
    Mp = _round_up(M0, tm)

    # Per-call data prep is limited to batch data: pad CLS rows and cast to bf16 for the MXU.
    x_p = jnp.pad(cls_emb_p.astype(jnp.bfloat16), ((0, Mp - B), (0, 0)))

    def _run(single_buffer):
        res_bufs = 1 if single_buffer else 2

        def plan(tk, w_bufs):
            return (2 * tm * tk * 2                       # x tile (bf16, double-buffered)
                    + w_bufs * tk * Hp * 2                # encoder weight (bf16)
                    + res_bufs * (2 * Hp * 4 + Hp * 128 * 2)   # misc row pair + regressor slab
                    + 2 * tm * 128 * 4                    # logits tile (f32, double-buffered)
                    + tm * Hp * 4)                        # f32 accumulator scratch

        # K-tile selection: keep the full weight resident when it fits the VMEM budget, otherwise
        # stream (tk, Hp) blocks along an "arbitrary" reduction axis.
        if k_tile_override is not None:
            tk = int(k_tile_override)
            assert Hp % tk == 0 and tk % 128 == 0
        elif plan(Hp, 1 if single_buffer else 2) <= budget:
            tk = Hp
        else:
            tk = 128
            n = Hp // 128
            for d in range(1, n + 1):
                if n % d == 0 and plan(Hp // d, 2) <= budget:
                    tk = Hp // d
                    break
        k_steps = Hp // tk
        resident_w = (k_steps == 1)
        w_bufs = 1 if (resident_w and single_buffer) else 2

        # VMEM limit from the real buffer plan; never clamp below the requirement.
        need = plan(tk, w_bufs)
        vmem_limit = need + max(need // 2, 2 << 20)
        vmem_limit = min(vmem_limit, max(budget, need + (1 << 20)))
        vmem_limit = max(vmem_limit, need + (1 << 20), 16 << 20)

        def const_spec(shape):
            # Constant index map -> the block never changes; single-buffer it when supported.
            if single_buffer:
                return pl.BlockSpec(shape, lambda i, k: (0, 0), pipeline_mode=pl.Buffered(1))
            return pl.BlockSpec(shape, lambda i, k: (0, 0))

        if resident_w:
            w_spec = const_spec((Hp, Hp))
        else:
            w_spec = pl.BlockSpec((tk, Hp), lambda i, k: (k, 0))

        grid = (Mp // tm, k_steps)
        return pl.pallas_call(
            _saliency_head_kernel,
            out_shape=jax.ShapeDtypeStruct((Mp, 128), jnp.float32),
            grid=grid,
            in_specs=[
                pl.BlockSpec((tm, tk), lambda i, k: (i, k)),   # streamed CLS-row tile
                w_spec,                                        # encoder weight
                const_spec((2, Hp)),                           # packed enc bias + reg bias row
                const_spec((Hp, 128)),                         # regressor weight slab
            ],
            out_specs=pl.BlockSpec((tm, 128), lambda i, k: (i, 0)),
            scratch_shapes=[pltpu.VMEM((tm, Hp), jnp.float32)],
            compiler_params=pltpu.CompilerParams(
                dimension_semantics=("parallel", "arbitrary"),
                vmem_limit_bytes=int(vmem_limit),
            ),
        )(x_p, w_p, misc, rw_slab)

    try:
        slab = _run(single_buffer=True)
    except Exception:
        # pl.Buffered(1) unsupported on this JAX/Mosaic version -> default double buffering.
        slab = _run(single_buffer=False)

    return slab[:B, 0]


# -----------------------------------------------------------------------------
# Parameter construction / one-time prep (padding + bf16 casting hoisted out of the call path)
# -----------------------------------------------------------------------------
def make_params(key, vocab=50, hidden=32):
    k0, k1, k2, k3 = jax.random.split(key, 4)
    emb_table = jax.random.normal(k0, (vocab, hidden), jnp.float32) * 0.02
    enc_w = jax.random.normal(k1, (hidden, hidden), jnp.float32) * (1.0 / hidden ** 0.5)
    enc_b = jnp.zeros((hidden,), jnp.float32)
    reg_w = jax.random.normal(k2, (hidden, 1), jnp.float32) * (1.0 / hidden ** 0.5)
    reg_b = jax.random.normal(k3, (1,), jnp.float32) * 0.01
    return emb_table, enc_w, enc_b, reg_w, reg_b


def prepare_params(raw_params):
    """Pad/cast the weights once; per-call work is then limited to the batch data."""
    emb_table, enc_w, enc_b, reg_w, reg_b = raw_params
    V, H = emb_table.shape
    Hp = _round_up(max(H, 128), 128)

    # Zero padding is exact: tanh(0)=0 and padded bias / regressor lanes are zero, so padded
    # lanes never leak into the logit.
    emb_p = jnp.zeros((V, Hp), jnp.float32).at[:, :H].set(emb_table)            # lane-padded f32
    w_p = jnp.zeros((Hp, Hp), jnp.float32).at[:H, :H].set(enc_w).astype(jnp.bfloat16)
    misc = jnp.zeros((2, Hp), jnp.float32)
    misc = misc.at[0, :H].set(enc_b)                                            # encoder bias
    misc = misc.at[1, :].set(reg_b.astype(jnp.float32)[0])                      # reg bias (replicated)
    rw_slab = jnp.zeros((Hp, 128), jnp.float32).at[:H, 0].set(reg_w[:, 0]).astype(jnp.bfloat16)

    return {"emb": emb_p, "w": w_p, "misc": misc, "rw_slab": rw_slab,
            "H": H, "Hp": Hp,
            "enc_w": enc_w, "enc_b": enc_b, "reg_w": reg_w, "reg_b": reg_b}


# -----------------------------------------------------------------------------
# Forward pass (mirror of SaliencyModel.forward, eval mode)
# -----------------------------------------------------------------------------
def saliency_forward(input_ids, prep, labels=None, use_pallas=None, k_tile_override=None):
    H, Hp = prep["H"], prep["Hp"]
    cls_ids = input_ids[:, 0]
    B = cls_ids.shape[0]

    if use_pallas is None:
        # Tiny problems are pure launch/padding overhead for Pallas; let XLA fuse them.
        use_pallas = (B * Hp) >= 4096

    if use_pallas:
        # CLS-only gather (valid for the per-token synthetic encoder): [B, Hp], already lane-padded.
        cls_emb = jnp.take(prep["emb"], cls_ids, axis=0)
        logits = _fused_head(cls_emb, prep["w"], prep["misc"], prep["rw_slab"],
                             k_tile_override=k_tile_override)
    else:
        cls_emb = jnp.take(prep["emb"], cls_ids, axis=0)[:, :H]
        h = jnp.tanh(cls_emb @ prep["enc_w"] + prep["enc_b"])
        logits = jax.nn.sigmoid(h @ prep["reg_w"] + prep["reg_b"])[:, 0]

    if labels is None:
        return logits
    # F.mse_loss(logits, labels.float()) with mean reduction over B scalars.
    diff = logits - labels.astype(jnp.float32)
    return jnp.mean(diff * diff), logits


if __name__ == "__main__":
    key = jax.random.PRNGKey(0)

    # ---- Primary demo: small shapes consistent with the module (batch=2, seq=8, hidden=32) ----
    B, S, H, V = 2, 8, 32, 50
    k_ids, k_lbl, k_par, k_next = jax.random.split(key, 4)
    input_ids = jax.random.randint(k_ids, (B, S), 0, V, dtype=jnp.int32)
    labels = jax.random.uniform(k_lbl, (B,), jnp.float32)
    prep = prepare_params(make_params(k_par, vocab=V, hidden=H))

    # Forced Pallas path, labels=None: returns logits only.
    logits = saliency_forward(input_ids, prep, labels=None, use_pallas=True)
    jax.block_until_ready(logits)
    # Pure-JAX f32 reference (also the auto-bypass path for tiny problems).
    ref_logits = saliency_forward(input_ids, prep, labels=None, use_pallas=False)
    assert logits.shape == (B,)
    assert bool(jnp.all(jnp.isfinite(logits)))
    assert bool(jnp.allclose(logits, ref_logits, atol=3e-2))

    # labels path: returns (mse_loss, logits)
    loss, logits2 = saliency_forward(input_ids, prep, labels=labels, use_pallas=True)
    jax.block_until_ready((loss, logits2))
    assert loss.shape == () and logits2.shape == (B,)
    assert bool(jnp.isfinite(loss))

    # ---- Secondary check: exercise the K-tiled accumulation path (k_steps > 1) ----
    B2, S2, H2, V2 = 16, 8, 256, 64
    ka, kb, kc = jax.random.split(k_next, 3)
    ids2 = jax.random.randint(ka, (B2, S2), 0, V2, dtype=jnp.int32)
    lbl2 = jax.random.uniform(kb, (B2,), jnp.float32)
    prep2 = prepare_params(make_params(kc, vocab=V2, hidden=H2))
    loss2, log2 = saliency_forward(ids2, prep2, labels=lbl2, use_pallas=True, k_tile_override=128)
    ref2 = saliency_forward(ids2, prep2, labels=None, use_pallas=False)
    jax.block_until_ready((loss2, log2))
    assert log2.shape == (B2,) and bool(jnp.allclose(log2, ref2, atol=3e-2))
    assert bool(jnp.isfinite(loss2))

    print("KERNEL_OK")
</pallas_src>

<mosaic_0001>
module attributes {stable_mosaic.version = 11 : i64} {
  func.func @_saliency_head_kernel(%arg0: i32, %arg1: i32, %arg2: memref<8x128xbf16, #tpu.memory_space<vmem>>, %arg3: memref<128x128xbf16, #tpu.memory_space<vmem>>, %arg4: memref<2x128xf32, #tpu.memory_space<vmem>>, %arg5: memref<128x128xbf16, #tpu.memory_space<vmem>>, %arg6: memref<8x128xf32, #tpu.memory_space<vmem>>, %arg7: memref<8x128xf32, #tpu.memory_space<vmem>>) attributes {dimension_semantics = [#tpu.dimension_semantics<parallel>, #tpu.dimension_semantics<arbitrary>], iteration_bounds = array<i64: 1, 1>, scalar_prefetch = 0 : i64, scratch_operands = 1 : i64, tpu.core_type = #tpu.core_type<tc>, window_params = [{transform_indices = @transform_0, window_bounds = array<i64: 8, 128>}, {pipeline_mode = #tpu.pipeline_mode<synchronous>, transform_indices = @transform_1, window_bounds = array<i64: 128, 128>}, {pipeline_mode = #tpu.pipeline_mode<synchronous>, transform_indices = @transform_2, window_bounds = array<i64: 2, 128>}, {pipeline_mode = #tpu.pipeline_mode<synchronous>, transform_indices = @transform_3, window_bounds = array<i64: 128, 128>}, {transform_indices = @transform_4, window_bounds = array<i64: 8, 128>}]} {
    %c0_i32 = arith.constant 0 : i32
    %0 = arith.cmpi eq, %arg1, %c0_i32 : i32
    %1 = arith.extui %0 : i1 to i32
    %c0_i32_0 = arith.constant 0 : i32
    %2 = arith.cmpi ne, %1, %c0_i32_0 : i32
    scf.if %2 {
      %cst_10 = arith.constant 0.000000e+00 : f32
      %12 = vector.broadcast %cst_10 : f32 to vector<8x128xf32>
      %c0_11 = arith.constant 0 : index
      %c0_12 = arith.constant 0 : index
      %13 = vector.load %arg7[%c0_11, %c0_12] : memref<8x128xf32, #tpu.memory_space<vmem>>, vector<8x128xf32>
      tpu.vector_store %arg7[%c0_11, %c0_12], %12 {strides = array<i32>} : memref<8x128xf32, #tpu.memory_space<vmem>>, vector<8x128xf32>,
    } else {
    }
    %c0 = arith.constant 0 : index
    %c0_1 = arith.constant 0 : index
    %3 = vector.load %arg7[%c0, %c0_1] : memref<8x128xf32, #tpu.memory_space<vmem>>, vector<8x128xf32>
    %c0_2 = arith.constant 0 : index
    %c0_3 = arith.constant 0 : index
    %4 = vector.load %arg2[%c0_2, %c0_3] : memref<8x128xbf16, #tpu.memory_space<vmem>>, vector<8x128xbf16>
    %c0_4 = arith.constant 0 : index
    %c0_5 = arith.constant 0 : index
    %5 = vector.load %arg3[%c0_4, %c0_5] : memref<128x128xbf16, #tpu.memory_space<vmem>>, vector<128x128xbf16>
    %cst = arith.constant dense<0.000000e+00> : vector<8x128xf32>
    %6 = tpu.matmul %4, %5, %cst {dimension_numbers = #tpu.dot_dimension_numbers<[1], [0], [0], [1], [0, 0, 1, 1], [], []>} : vector<8x128xbf16>, vector<128x128xbf16>, vector<8x128xf32> -> vector<8x128xf32>
    %7 = arith.addf %3, %6 : vector<8x128xf32>
    %c0_6 = arith.constant 0 : index
    %c0_7 = arith.constant 0 : index
    %8 = vector.load %arg7[%c0_6, %c0_7] : memref<8x128xf32, #tpu.memory_space<vmem>>, vector<8x128xf32>
    tpu.vector_store %arg7[%c0_6, %c0_7], %7 {strides = array<i32>} : memref<8x128xf32, #tpu.memory_space<vmem>>, vector<8x128xf32>,
    %c0_i32_8 = arith.constant 0 : i32
    %9 = arith.cmpi eq, %arg1, %c0_i32_8 : i32
    %10 = arith.extui %9 : i1 to i32
    %c0_i32_9 = arith.constant 0 : i32
    %11 = arith.cmpi ne, %10, %c0_i32_9 : i32
    scf.if %11 {
      %c0_10 = arith.constant 0 : index
      %c0_11 = arith.constant 0 : index
      %12 = vector.load %arg7[%c0_10, %c0_11] : memref<8x128xf32, #tpu.memory_space<vmem>>, vector<8x128xf32>
      %c0_12 = arith.constant 0 : index
      %c0_13 = arith.constant 0 : index
      %13 = vector.load %arg4[%c0_12, %c0_13] : memref<2x128xf32, #tpu.memory_space<vmem>>, vector<1x128xf32>
      %14 = vector.broadcast %13 : vector<1x128xf32> to vector<8x128xf32>
      %15 = arith.addf %12, %14 : vector<8x128xf32>
      %16 = math.tanh %15 : vector<8x128xf32>
      %17 = arith.truncf %16 : vector<8x128xf32> to vector<8x128xbf16>
      %c0_14 = arith.constant 0 : index
      %c0_15 = arith.constant 0 : index
      %18 = vector.load %arg5[%c0_14, %c0_15] : memref<128x128xbf16, #tpu.memory_space<vmem>>, vector<128x128xbf16>
      %cst_16 = arith.constant dense<0.000000e+00> : vector<8x128xf32>
      %19 = tpu.matmul %17, %18, %cst_16 {dimension_numbers = #tpu.dot_dimension_numbers<[1], [0], [0], [1], [0, 0, 1, 1], [], []>} : vector<8x128xbf16>, vector<128x128xbf16>, vector<8x128xf32> -> vector<8x128xf32>
      %c1 = arith.constant 1 : index
      %c0_17 = arith.constant 0 : index
      %20 = vector.load %arg4[%c1, %c0_17] : memref<2x128xf32, #tpu.memory_space<vmem>>, vector<1x128xf32>
      %21 = vector.broadcast %20 : vector<1x128xf32> to vector<8x128xf32>
      %22 = arith.addf %19, %21 : vector<8x128xf32>
      %23 = arith.negf %22 : vector<8x128xf32>
      %24 = math.exp %23 : vector<8x128xf32>
      %cst_18 = arith.constant 1.000000e+00 : f32
      %25 = vector.broadcast %cst_18 : f32 to vector<8x128xf32>
      %26 = arith.addf %25, %24 : vector<8x128xf32>
      %27 = arith.divf %25, %26 : vector<8x128xf32>
      %c0_19 = arith.constant 0 : index
      %c0_20 = arith.constant 0 : index
      %28 = vector.load %arg6[%c0_19, %c0_20] : memref<8x128xf32, #tpu.memory_space<vmem>>, vector<8x128xf32>
      tpu.vector_store %arg6[%c0_19, %c0_20], %27 {strides = array<i32>} : memref<8x128xf32, #tpu.memory_space<vmem>>, vector<8x128xf32>,
    } else {
    }
    return
  }
  func.func @transform_0(%arg0: i32, %arg1: i32) -> (i32, i32) {
    %c0_i32 = arith.constant 0 : i32
    return %arg0, %arg1 : i32, i32
  }
  func.func @transform_1(%arg0: i32, %arg1: i32) -> (i32, i32) {
    %c0_i32 = arith.constant 0 : i32
    %c0_i32_0 = arith.constant 0 : i32
    %c0_i32_1 = arith.constant 0 : i32
    return %c0_i32, %c0_i32_0 : i32, i32
  }
  func.func @transform_2(%arg0: i32, %arg1: i32) -> (i32, i32) {
    %c0_i32 = arith.constant 0 : i32
    %c0_i32_0 = arith.constant 0 : i32
    %c0_i32_1 = arith.constant 0 : i32
    return %c0_i32, %c0_i32_0 : i32, i32
  }
  func.func @transform_3(%arg0: i32, %arg1: i32) -> (i32, i32) {
    %c0_i32 = arith.constant 0 : i32
    %c0_i32_0 = arith.constant 0 : i32
    %c0_i32_1 = arith.constant 0 : i32
    return %c0_i32, %c0_i32_0 : i32, i32
  }
  func.func @transform_4(%arg0: i32, %arg1: i32) -> (i32, i32) {
    %c0_i32 = arith.constant 0 : i32
    %c0_i32_0 = arith.constant 0 : i32
    return %arg0, %c0_i32 : i32, i32
  }
}

module attributes {stable_mosaic.version = 11 : i64} {
  func.func @_saliency_head_kernel(%arg0: i32, %arg1: i32, %arg2: memref<8x128xbf16, #tpu.memory_space<vmem>>, %arg3: memref<128x128xbf16, #tpu.memory_space<vmem>>, %arg4: memref<2x128xf32, #tpu.memory_space<vmem>>, %arg5: memref<128x128xbf16, #tpu.memory_space<vmem>>, %arg6: memref<8x128xf32, #tpu.memory_space<vmem>>, %arg7: memref<8x128xf32, #tpu.memory_space<vmem>>) attributes {dimension_semantics = [#tpu.dimension_semantics<parallel>, #tpu.dimension_semantics<arbitrary>], iteration_bounds = array<i64: 1, 1>, scalar_prefetch = 0 : i64, scratch_operands = 1 : i64, tpu.core_type = #tpu.core_type<tc>, window_params = [{transform_indices = @transform_0, window_bounds = array<i64: 8, 128>}, {pipeline_mode = #tpu.pipeline_mode<synchronous>, transform_indices = @transform_1, window_bounds = array<i64: 128, 128>}, {pipeline_mode = #tpu.pipeline_mode<synchronous>, transform_indices = @transform_2, window_bounds = array<i64: 2, 128>}, {pipeline_mode = #tpu.pipeline_mode<synchronous>, transform_indices = @transform_3, window_bounds = array<i64: 128, 128>}, {transform_indices = @transform_4, window_bounds = array<i64: 8, 128>}]} {
    %c0_i32 = arith.constant 0 : i32
    %0 = arith.cmpi eq, %arg1, %c0_i32 : i32
    %1 = arith.extui %0 : i1 to i32
    %c0_i32_0 = arith.constant 0 : i32
    %2 = arith.cmpi ne, %1, %c0_i32_0 : i32
    scf.if %2 {
      %cst_10 = arith.constant 0.000000e+00 : f32
      %12 = vector.broadcast %cst_10 : f32 to vector<8x128xf32>
      %c0_11 = arith.constant 0 : index
      %c0_12 = arith.constant 0 : index
      %13 = vector.load %arg7[%c0_11, %c0_12] : memref<8x128xf32, #tpu.memory_space<vmem>>, vector<8x128xf32>
      tpu.vector_store %arg7[%c0_11, %c0_12], %12 {strides = array<i32>} : memref<8x128xf32, #tpu.memory_space<vmem>>, vector<8x128xf32>,
    } else {
    }
    %c0 = arith.constant 0 : index
    %c0_1 = arith.constant 0 : index
    %3 = vector.load %arg7[%c0, %c0_1] : memref<8x128xf32, #tpu.memory_space<vmem>>, vector<8x128xf32>
    %c0_2 = arith.constant 0 : index
    %c0_3 = arith.constant 0 : index
    %4 = vector.load %arg2[%c0_2, %c0_3] : memref<8x128xbf16, #tpu.memory_space<vmem>>, vector<8x128xbf16>
    %c0_4 = arith.constant 0 : index
    %c0_5 = arith.constant 0 : index
    %5 = vector.load %arg3[%c0_4, %c0_5] : memref<128x128xbf16, #tpu.memory_space<vmem>>, vector<128x128xbf16>
    %cst = arith.constant dense<0.000000e+00> : vector<8x128xf32>
    %6 = tpu.matmul %4, %5, %cst {dimension_numbers = #tpu.dot_dimension_numbers<[1], [0], [0], [1], [0, 0, 1, 1], [], []>} : vector<8x128xbf16>, vector<128x128xbf16>, vector<8x128xf32> -> vector<8x128xf32>
    %7 = arith.addf %3, %6 : vector<8x128xf32>
    %c0_6 = arith.constant 0 : index
    %c0_7 = arith.constant 0 : index
    %8 = vector.load %arg7[%c0_6, %c0_7] : memref<8x128xf32, #tpu.memory_space<vmem>>, vector<8x128xf32>
    tpu.vector_store %arg7[%c0_6, %c0_7], %7 {strides = array<i32>} : memref<8x128xf32, #tpu.memory_space<vmem>>, vector<8x128xf32>,
    %c0_i32_8 = arith.constant 0 : i32
    %9 = arith.cmpi eq, %arg1, %c0_i32_8 : i32
    %10 = arith.extui %9 : i1 to i32
    %c0_i32_9 = arith.constant 0 : i32
    %11 = arith.cmpi ne, %10, %c0_i32_9 : i32
    scf.if %11 {
      %c0_10 = arith.constant 0 : index
      %c0_11 = arith.constant 0 : index
      %12 = vector.load %arg7[%c0_10, %c0_11] : memref<8x128xf32, #tpu.memory_space<vmem>>, vector<8x128xf32>
      %c0_12 = arith.constant 0 : index
      %c0_13 = arith.constant 0 : index
      %13 = vector.load %arg4[%c0_12, %c0_13] : memref<2x128xf32, #tpu.memory_space<vmem>>, vector<1x128xf32>
      %14 = vector.broadcast %13 : vector<1x128xf32> to vector<8x128xf32>
      %15 = arith.addf %12, %14 : vector<8x128xf32>
      %16 = math.tanh %15 : vector<8x128xf32>
      %17 = arith.truncf %16 : vector<8x128xf32> to vector<8x128xbf16>
      %c0_14 = arith.constant 0 : index
      %c0_15 = arith.constant 0 : index
      %18 = vector.load %arg5[%c0_14, %c0_15] : memref<128x128xbf16, #tpu.memory_space<vmem>>, vector<128x128xbf16>
      %cst_16 = arith.constant dense<0.000000e+00> : vector<8x128xf32>
      %19 = tpu.matmul %17, %18, %cst_16 {dimension_numbers = #tpu.dot_dimension_numbers<[1], [0], [0], [1], [0, 0, 1, 1], [], []>} : vector<8x128xbf16>, vector<128x128xbf16>, vector<8x128xf32> -> vector<8x128xf32>
      %c1 = arith.constant 1 : index
      %c0_17 = arith.constant 0 : index
      %20 = vector.load %arg4[%c1, %c0_17] : memref<2x128xf32, #tpu.memory_space<vmem>>, vector<1x128xf32>
      %21 = vector.broadcast %20 : vector<1x128xf32> to vector<8x128xf32>
      %22 = arith.addf %19, %21 : vector<8x128xf32>
      %23 = arith.negf %22 : vector<8x128xf32>
      %24 = math.exp %23 : vector<8x128xf32>
      %cst_18 = arith.constant 1.000000e+00 : f32
      %25 = vector.broadcast %cst_18 : f32 to vector<8x128xf32>
      %26 = arith.addf %25, %24 : vector<8x128xf32>
      %27 = arith.divf %25, %26 : vector<8x128xf32>
      %c0_19 = arith.constant 0 : index
      %c0_20 = arith.constant 0 : index
      %28 = vector.load %arg6[%c0_19, %c0_20] : memref<8x128xf32, #tpu.memory_space<vmem>>, vector<8x128xf32>
      tpu.vector_store %arg6[%c0_19, %c0_20], %27 {strides = array<i32>} : memref<8x128xf32, #tpu.memory_space<vmem>>, vector<8x128xf32>,
    } else {
    }
    return
  }
  func.func @transform_0(%arg0: i32, %arg1: i32) -> (i32, i32) {
    %c0_i32 = arith.constant 0 : i32
    return %arg0, %arg1 : i32, i32
  }
  func.func @transform_1(%arg0: i32, %arg1: i32) -> (i32, i32) {
    %c0_i32 = arith.constant 0 : i32
    %c0_i32_0 = arith.constant 0 : i32
    %c0_i32_1 = arith.constant 0 : i32
    return %c0_i32, %c0_i32_0 : i32, i32
  }
  func.func @transform_2(%arg0: i32, %arg1: i32) -> (i32, i32) {
    %c0_i32 = arith.constant 0 : i32
    %c0_i32_0 = arith.constant 0 : i32
    %c0_i32_1 = arith.constant 0 : i32
    return %c0_i32, %c0_i32_0 : i32, i32
  }
  func.func @transform_3(%arg0: i32, %arg1: i32) -> (i32, i32) {
    %c0_i32 = arith.constant 0 : i32
    %c0_i32_0 = arith.constant 0 : i32
    %c0_i32_1 = arith.constant 0 : i32
    return %c0_i32, %c0_i32_0 : i32, i32
  }
  func.func @transform_4(%arg0: i32, %arg1: i32) -> (i32, i32) {
    %c0_i32 = arith.constant 0 : i32
    %c0_i32_0 = arith.constant 0 : i32
    return %arg0, %c0_i32 : i32, i32
  }
}

</mosaic_0001>

<bundles_post_ra>
// kernel: tpu_custom_call.1
= control target key start
LH: loop header
LB: loop body
LE: loop exit
PB: predicated region body
PF: predicated region fallthrough
CT: control target
= control target key end

     0   :  { %9 = vsyncpa [#allocation4], 0  ;;  %s609_s0 = inlined_call_operand.hbm [shape: bf16[8,128], index: 0, kind: input, shape index: {}]   ;;  %s610_s1 = inlined_call_operand.hbm [shape: bf16[128,128], index: 1, kind: input, shape index: {}]   ;;  %s611_s2 = inlined_call_operand.vmem [shape: f32[2,128], index: 2, kind: input, shape index: {}]   ;;  %s612_s3 = inlined_call_operand.hbm [shape: bf16[128,128], index: 3, kind: input, shape index: {}]   ;;  %s613_s4 = inlined_call_operand.hbm [shape: f32[8,128], index: 4, kind: output, shape index: {}]  }
   0x1   :  { %10 = vsyncpa [#allocation7], 0 }
   0x2   :  { %11 = vsyncpa [#allocation5], 0  ;;  %s516_s15 = smov [#allocation6]   ;;  %s422_s19 = scalar_lea.hbm %s610_s1, 1024 }
   0x3   :  { %s27_s16 = sshll.u32 %s516_s15, 4  ;;  %p423_p0 = scmp.ne.s32.totalorder %s610_s1, %s422_s19  ;;  %s28_s16 = int_to_ptr.vmem [resolvable:$true] %s27_s16 }
   0x4   :  { %p426_p1 = scmp.lt.u32.totalorder %s422_s19, %s610_s1 }
   0x6   :  { %p428_p2 = pnand %p426_p1, %p423_p0 }
   0x8   :  { %431 = shalt.err (!%p428_p2)
}
   0x9   :  { %s432_s24 = scalar_lea.vmem %s28_s16, 1024  ;;  %p437_p4 = scmp.lt.s32.totalorder %s28_s16, %s28_s16 }
   0xa   :  { %p433_p3 = scmp.ne.s32.totalorder %s28_s16, %s432_s24  ;;  %p438_p5 = scmp.lt.s32.totalorder %s432_s24, %s432_s24 }
   0xc   :  { %p439_p6 = por %p438_p5, %p437_p4 }
   0xe   :  { %p440_p7 = pnand %p439_p6, %p433_p3 }
  0x10   :  { %443 = shalt.err (!%p440_p7)
}
  0x11   :  { %s517_s25 = smov 64   ;;  %s518_s26 = smov 4  }
  0x12   :  { %33 = dma.hbm_to_vmem [thread:$0]  %s610_s1, 1024, %s28_s16, [#allocation7], %s517_s25, %s517_s25, %s518_s26  }
  0x13   :  { %s519_s29 = smov [#allocation3]   ;;  %s520_s5 = smov [#allocation8]  }
  0x14   :  { %s18_s30 = sshll.u32 %s519_s29, 4  ;;  %s41_s6 = sshll.u32 %s520_s5, 4  ;;  %s19_s30 = int_to_ptr.vmem [resolvable:$true] %s18_s30  ;;  %s42_s6 = int_to_ptr.vmem [resolvable:$true] %s41_s6 }
  0x15   :  { %s444_s9 = scalar_lea.hbm %s609_s0, 64 }
  0x16   :  { %p445_p8 = scmp.ne.s32.totalorder %s609_s0, %s444_s9  ;;  %p448_p9 = scmp.lt.u32.totalorder %s444_s9, %s609_s0 }
  0x18   :  { %p450_p10 = pnand %p448_p9, %p445_p8 }
  0x1a   :  { %453 = shalt.err (!%p450_p10)
}
  0x1b   :  { %s454_s1 = scalar_lea.vmem %s19_s30, 64  ;;  %p459_p12 = scmp.lt.s32.totalorder %s19_s30, %s19_s30 }
  0x1c   :  { %p455_p11 = scmp.ne.s32.totalorder %s19_s30, %s454_s1  ;;  %p460_p13 = scmp.lt.s32.totalorder %s454_s1, %s454_s1 }
  0x1e   :  { %p461_p0 = por %p460_p13, %p459_p12 }
  0x20   :  { %p462_p1 = pnand %p461_p0, %p455_p11 }
  0x22   :  { %465 = shalt.err (!%p462_p1)
}
  0x23   :  { %21 = dma.hbm_to_vmem [thread:$0]  %s609_s0, 64, %s19_s30, [#allocation4]  }
  0x24   :  { %s466_s18 = scalar_lea.hbm %s612_s3, 1024 }
  0x25   :  { %p467_p2 = scmp.ne.s32.totalorder %s612_s3, %s466_s18  ;;  %p470_p3 = scmp.lt.u32.totalorder %s466_s18, %s612_s3 }
  0x27   :  { %p472_p4 = pnand %p470_p3, %p467_p2 }
  0x29   :  { %475 = shalt.err (!%p472_p4)
}
  0x2a   :  { %s476_s23 = scalar_lea.vmem %s42_s6, 1024  ;;  %p481_p6 = scmp.lt.s32.totalorder %s42_s6, %s42_s6 }
  0x2b   :  { %p477_p5 = scmp.ne.s32.totalorder %s42_s6, %s476_s23  ;;  %p482_p7 = scmp.lt.s32.totalorder %s476_s23, %s476_s23 }
  0x2d   :  { %p483_p8 = por %p482_p7, %p481_p6 }
  0x2f   :  { %p484_p9 = pnand %p483_p8, %p477_p5 }
  0x31   :  { %487 = shalt.err (!%p484_p9)
}
  0x32   :  { %47 = dma.hbm_to_vmem [thread:$0]  %s612_s3, 1024, %s42_s6, [#allocation7], %s517_s25, %s517_s25, %s518_s26  }
  0x33   :  { %510 = dma.done.wait [#allocation4], 64  }
  0x34   :  { %511 = vsyncadd [#allocation4], 4294967232 }
  0x35   :  { %512 = dma.done.wait [#allocation7], 2048  }
  0x36   :  { %513 = vsyncadd [#allocation7], 4294965248  ;;  %v521_v0 = vmov 0.0   ;;  %vm522_vm0 = vmmov 0   ;;  %v400_v1 = vld [vmem:[#allocation6] sm:$0xff]   ;;  %v401_v2 = vld [vmem:[#allocation6 + $0x8] sm:$0xff]  }
  0x37   :  { %352 = vmatprep.subr.bf16.mxu0 %v521_v0  ;;  %368 = vmatprep.mubr.msk.bf16.mxu0 %vm522_vm0, %v521_v0  ;;  %v402_v3 = vld [vmem:[#allocation6 + $0x10] sm:$0xff]   ;;  %v408_v4 = vld [vmem:[#allocation8] sm:$0xff]   ;;  %v403_v5 = vld [vmem:[#allocation6 + $0x18] sm:$0xff]   ;;  %s523_s28 = smov [#allocation9]  }
  0x38   :  { %372 = vmatprep.subr.bf16.mxu1 %v521_v0  ;;  %388 = vmatprep.mubr.msk.bf16.mxu1 %vm522_vm0, %v521_v0  ;;  %v409_v6 = vld [vmem:[#allocation8 + $0x8] sm:$0xff]   ;;  %v404_v7 = vld [vmem:[#allocation6 + $0x20] sm:$0xff]   ;;  %v410_v8 = vld [vmem:[#allocation8 + $0x10] sm:$0xff]   ;;  %s305_s29 = sshll.u32 %s523_s28, 4  ;;  %s306_s29 = int_to_ptr.vmem [resolvable:$true] %s305_s29 }
  0x39   :  { %353 = vmatpush3.bf16.msra.mxu0 %v400_v1  ;;  %373 = vmatpush3.bf16.msra.mxu1 %v408_v4  ;;  %v405_v9 = vld [vmem:[#allocation6 + $0x28] sm:$0xff]   ;;  %v411_v10 = vld [vmem:[#allocation8 + $0x18] sm:$0xff]   ;;  %v406_v11 = vld [vmem:[#allocation6 + $0x30] sm:$0xff]   ;;  %s488_s30 = scalar_lea.vmem %s306_s29, 128  ;;  %p493_p11 = scmp.lt.s32.totalorder %s306_s29, %s306_s29 }
  0x3a   :  { %354 = vmatprep.subr.bf16.mxu0 %v521_v0  ;;  %374 = vmatprep.subr.bf16.mxu1 %v521_v0  ;;  %v407_v12 = vld [vmem:[#allocation6 + $0x38] sm:$0xff]   ;;  %v412_v14 = vld [vmem:[#allocation8 + $0x20] sm:$0xff]   ;;  %v413_v15 = vld [vmem:[#allocation8 + $0x28] sm:$0xff]   ;;  %p489_p10 = scmp.ne.s32.totalorder %s306_s29, %s488_s30  ;;  %p494_p12 = scmp.lt.s32.totalorder %s488_s30, %s488_s30 }
  0x3b   :  { %v64_v13 = vld [vmem:[#allocation3] sm:$0xf]  ;;  %v414_v16 = vld [vmem:[#allocation8 + $0x30] sm:$0xff]  }
  0x3c   :  { %v415_v17 = vld [vmem:[#allocation8 + $0x38] sm:$0xff]   ;;  %p495_p13 = por %p494_p12, %p493_p11 }
  0x3d   :  { %355 = vmatpush3.bf16.msra.mxu0 %v401_v2  ;;  %375 = vmatpush3.bf16.msra.mxu1 %v409_v6  ;;  %v323_v18 = vld [vmem:[%s611_s2] ss:$0 sm:$0xff]  ;;  %v324_v26 = vld [vmem:[%s611_s2 + $0x1] ss:$0 sm:$0xff] }
  0x3e   :  { %356 = vmatprep.subr.bf16.mxu0 %v521_v0  ;;  %376 = vmatprep.subr.bf16.mxu1 %v521_v0  ;;  %p496_p0 = pnand %p495_p13, %p489_p10 }
  0x41   :  { %357 = vmatpush3.bf16.msra.mxu0 %v402_v3  ;;  %377 = vmatpush3.bf16.msra.mxu1 %v410_v8 }
  0x42   :  { %358 = vmatprep.subr.bf16.mxu0 %v521_v0  ;;  %378 = vmatprep.subr.bf16.mxu1 %v521_v0 }
  0x45   :  { %359 = vmatpush3.bf16.msra.mxu0 %v403_v5  ;;  %379 = vmatpush3.bf16.msra.mxu1 %v411_v10 }
  0x46   :  { %360 = vmatprep.subr.bf16.mxu0 %v521_v0  ;;  %380 = vmatprep.subr.bf16.mxu1 %v521_v0 }
  0x49   :  { %361 = vmatpush3.bf16.msra.mxu0 %v404_v7  ;;  %381 = vmatpush3.bf16.msra.mxu1 %v412_v14 }
  0x4a   :  { %362 = vmatprep.subr.bf16.mxu0 %v521_v0  ;;  %382 = vmatprep.subr.bf16.mxu1 %v521_v0 }
  0x4d   :  { %363 = vmatpush3.bf16.msra.mxu0 %v405_v9  ;;  %383 = vmatpush3.bf16.msra.mxu1 %v413_v15 }
  0x4e   :  { %364 = vmatprep.subr.bf16.mxu0 %v521_v0  ;;  %384 = vmatprep.subr.bf16.mxu1 %v521_v0 }
  0x51   :  { %365 = vmatpush3.bf16.msra.mxu0 %v406_v11  ;;  %385 = vmatpush3.bf16.msra.mxu1 %v414_v16 }
  0x52   :  { %366 = vmatprep.subr.bf16.mxu0 %v521_v0  ;;  %386 = vmatprep.subr.bf16.mxu1 %v521_v0 }
  0x55   :  { %367 = vmatpush3.bf16.msra.mxu0 %v407_v12  ;;  %387 = vmatpush3.bf16.msra.mxu1 %v415_v17 }
  0x58   :  { %369 = vmatmul.mubr.bf16.vlgmr.msra.gmra.mrb[0].mxu0 %v64_v13 }
 0x12b   :  { %v163_v19 = vpop.f32.mrb[0].mxu0 }
 0x12c   :  { %v180_v20 = vadd.f32 %v323_v18, %v163_v19  ;;  %v370_v21 = vpop.f32.mrb[1].mxu0 }
 0x12d   :  { %v166_v22 = vpop.f32.mrb[2].mxu0 }
 0x12e   :  { %416 = vtanh.f32 %v180_v20  ;;  %v371_v23 = vpop.f32.mrb[3].mxu0 }
 0x138   :  { %v417_v24 = vpop.eup %416 }
 0x139   :  { %v182_v25 = vpack.c.bf16 %v417_v24, %v417_v24 }
 0x13b   :  { %389 = vmatmul.mubr.bf16.vlgmr.msra.gmra.mrb[0].mxu1 %v182_v25 }
 0x20e   :  { %v286_v27 = vpop.f32.mrb[0].mxu1 }
 0x20f   :  { %v287_v28 = vadd.f32 %v324_v26, %v286_v27  ;;  %v390_v29 = vpop.f32.mrb[1].mxu1 }
 0x210   :  { %v289_v30 = vpop.f32.mrb[2].mxu1 }
 0x211   :  { %v333_v31 = vmul.f32 -1.442695, %v287_v28  ;;  %v391_v32 = vpop.f32.mrb[3].mxu1 }
 0x213   :  { %418 = vpow2.f32 %v333_v31 }
 0x21d   :  { %v419_v33 = vpop.eup %418 }
 0x21e   :  { %v295_v34 = vadd.f32 1.0, %v419_v33 }
 0x220   :  { %420 = vrcp.f32 %v295_v34 }
 0x22a   :  { %v421_v35 = vpop.eup %420 }
 0x22b   :  { %298 = vst [vmem:[#allocation9] sm:$0xff] %v421_v35 }
 0x22c   :  { %499 = shalt.err (!%p496_p0)
}
 0x22d   :  { %s500_s6 = scalar_lea.hbm %s613_s4, 128 }
 0x22e   :  { %p501_p1 = scmp.ne.s32.totalorder %s613_s4, %s500_s6  ;;  %p504_p2 = scmp.lt.u32.totalorder %s500_s6, %s613_s4 }
 0x230   :  { %p506_p3 = pnand %p504_p2, %p501_p1 }
 0x232   :  { %509 = shalt.err (!%p506_p3)
}
 0x233   :  { %308 = dma.vmem_to_hbm [thread:$0]  %s306_s29, 128, %s613_s4, [#allocation5]  }
 0x234   :  { %514 = dma.done.wait [#allocation5], 128  }
 0x235   :  { %515 = vsyncadd [#allocation5], 4294967168 }
 0x236   :  { %312 = vsyncpa [#allocation4], 1 }
 0x237   :  { %313 = vsyncpa [#allocation7], 1 }
 0x238   :  { %314 = vsyncpa [#allocation5], 1 }

// kernel: tpu_custom_call.1
= control target key start
LH: loop header
LB: loop body
LE: loop exit
PB: predicated region body
PF: predicated region fallthrough
CT: control target
= control target key end

     0   :  { %9 = vsyncpa [#allocation4], 0  ;;  %s609_s0 = inlined_call_operand.hbm [shape: bf16[8,128], index: 0, kind: input, shape index: {}]   ;;  %s610_s1 = inlined_call_operand.hbm [shape: bf16[128,128], index: 1, kind: input, shape index: {}]   ;;  %s611_s2 = inlined_call_operand.vmem [shape: f32[2,128], index: 2, kind: input, shape index: {}]   ;;  %s612_s3 = inlined_call_operand.hbm [shape: bf16[128,128], index: 3, kind: input, shape index: {}]   ;;  %s613_s4 = inlined_call_operand.hbm [shape: f32[8,128], index: 4, kind: output, shape index: {}]  }
   0x1   :  { %10 = vsyncpa [#allocation7], 0 }
   0x2   :  { %11 = vsyncpa [#allocation5], 0  ;;  %s516_s15 = smov [#allocation6]   ;;  %s422_s19 = scalar_lea.hbm %s610_s1, 1024 }
   0x3   :  { %s27_s16 = sshll.u32 %s516_s15, 4  ;;  %p423_p0 = scmp.ne.s32.totalorder %s610_s1, %s422_s19  ;;  %s28_s16 = int_to_ptr.vmem [resolvable:$true] %s27_s16 }
   0x4   :  { %p426_p1 = scmp.lt.u32.totalorder %s422_s19, %s610_s1 }
   0x6   :  { %p428_p2 = pnand %p426_p1, %p423_p0 }
   0x8   :  { %431 = shalt.err (!%p428_p2)
}
   0x9   :  { %s432_s24 = scalar_lea.vmem %s28_s16, 1024  ;;  %p437_p4 = scmp.lt.s32.totalorder %s28_s16, %s28_s16 }
   0xa   :  { %p433_p3 = scmp.ne.s32.totalorder %s28_s16, %s432_s24  ;;  %p438_p5 = scmp.lt.s32.totalorder %s432_s24, %s432_s24 }
   0xc   :  { %p439_p6 = por %p438_p5, %p437_p4 }
   0xe   :  { %p440_p7 = pnand %p439_p6, %p433_p3 }
  0x10   :  { %443 = shalt.err (!%p440_p7)
}
  0x11   :  { %s517_s25 = smov 64   ;;  %s518_s26 = smov 4  }
  0x12   :  { %33 = dma.hbm_to_vmem [thread:$0]  %s610_s1, 1024, %s28_s16, [#allocation7], %s517_s25, %s517_s25, %s518_s26  }
  0x13   :  { %s519_s29 = smov [#allocation3]   ;;  %s520_s5 = smov [#allocation8]  }
  0x14   :  { %s18_s30 = sshll.u32 %s519_s29, 4  ;;  %s41_s6 = sshll.u32 %s520_s5, 4  ;;  %s19_s30 = int_to_ptr.vmem [resolvable:$true] %s18_s30  ;;  %s42_s6 = int_to_ptr.vmem [resolvable:$true] %s41_s6 }
  0x15   :  { %s444_s9 = scalar_lea.hbm %s609_s0, 64 }
  0x16   :  { %p445_p8 = scmp.ne.s32.totalorder %s609_s0, %s444_s9  ;;  %p448_p9 = scmp.lt.u32.totalorder %s444_s9, %s609_s0 }
  0x18   :  { %p450_p10 = pnand %p448_p9, %p445_p8 }
  0x1a   :  { %453 = shalt.err (!%p450_p10)
}
  0x1b   :  { %s454_s1 = scalar_lea.vmem %s19_s30, 64  ;;  %p459_p12 = scmp.lt.s32.totalorder %s19_s30, %s19_s30 }
  0x1c   :  { %p455_p11 = scmp.ne.s32.totalorder %s19_s30, %s454_s1  ;;  %p460_p13 = scmp.lt.s32.totalorder %s454_s1, %s454_s1 }
  0x1e   :  { %p461_p0 = por %p460_p13, %p459_p12 }
  0x20   :  { %p462_p1 = pnand %p461_p0, %p455_p11 }
  0x22   :  { %465 = shalt.err (!%p462_p1)
}
  0x23   :  { %21 = dma.hbm_to_vmem [thread:$0]  %s609_s0, 64, %s19_s30, [#allocation4]  }
  0x24   :  { %s466_s18 = scalar_lea.hbm %s612_s3, 1024 }
  0x25   :  { %p467_p2 = scmp.ne.s32.totalorder %s612_s3, %s466_s18  ;;  %p470_p3 = scmp.lt.u32.totalorder %s466_s18, %s612_s3 }
  0x27   :  { %p472_p4 = pnand %p470_p3, %p467_p2 }
  0x29   :  { %475 = shalt.err (!%p472_p4)
}
  0x2a   :  { %s476_s23 = scalar_lea.vmem %s42_s6, 1024  ;;  %p481_p6 = scmp.lt.s32.totalorder %s42_s6, %s42_s6 }
  0x2b   :  { %p477_p5 = scmp.ne.s32.totalorder %s42_s6, %s476_s23  ;;  %p482_p7 = scmp.lt.s32.totalorder %s476_s23, %s476_s23 }
  0x2d   :  { %p483_p8 = por %p482_p7, %p481_p6 }
  0x2f   :  { %p484_p9 = pnand %p483_p8, %p477_p5 }
  0x31   :  { %487 = shalt.err (!%p484_p9)
}
  0x32   :  { %47 = dma.hbm_to_vmem [thread:$0]  %s612_s3, 1024, %s42_s6, [#allocation7], %s517_s25, %s517_s25, %s518_s26  }
  0x33   :  { %510 = dma.done.wait [#allocation4], 64  }
  0x34   :  { %511 = vsyncadd [#allocation4], 4294967232 }
  0x35   :  { %512 = dma.done.wait [#allocation7], 2048  }
  0x36   :  { %513 = vsyncadd [#allocation7], 4294965248  ;;  %v521_v0 = vmov 0.0   ;;  %vm522_vm0 = vmmov 0   ;;  %v400_v1 = vld [vmem:[#allocation6] sm:$0xff]   ;;  %v401_v2 = vld [vmem:[#allocation6 + $0x8] sm:$0xff]  }
  0x37   :  { %352 = vmatprep.subr.bf16.mxu0 %v521_v0  ;;  %368 = vmatprep.mubr.msk.bf16.mxu0 %vm522_vm0, %v521_v0  ;;  %v402_v3 = vld [vmem:[#allocation6 + $0x10] sm:$0xff]   ;;  %v408_v4 = vld [vmem:[#allocation8] sm:$0xff]   ;;  %v403_v5 = vld [vmem:[#allocation6 + $0x18] sm:$0xff]   ;;  %s523_s28 = smov [#allocation9]  }
  0x38   :  { %372 = vmatprep.subr.bf16.mxu1 %v521_v0  ;;  %388 = vmatprep.mubr.msk.bf16.mxu1 %vm522_vm0, %v521_v0  ;;  %v409_v6 = vld [vmem:[#allocation8 + $0x8] sm:$0xff]   ;;  %v404_v7 = vld [vmem:[#allocation6 + $0x20] sm:$0xff]   ;;  %v410_v8 = vld [vmem:[#allocation8 + $0x10] sm:$0xff]   ;;  %s305_s29 = sshll.u32 %s523_s28, 4  ;;  %s306_s29 = int_to_ptr.vmem [resolvable:$true] %s305_s29 }
  0x39   :  { %353 = vmatpush3.bf16.msra.mxu0 %v400_v1  ;;  %373 = vmatpush3.bf16.msra.mxu1 %v408_v4  ;;  %v405_v9 = vld [vmem:[#allocation6 + $0x28] sm:$0xff]   ;;  %v411_v10 = vld [vmem:[#allocation8 + $0x18] sm:$0xff]   ;;  %v406_v11 = vld [vmem:[#allocation6 + $0x30] sm:$0xff]   ;;  %s488_s30 = scalar_lea.vmem %s306_s29, 128  ;;  %p493_p11 = scmp.lt.s32.totalorder %s306_s29, %s306_s29 }
  0x3a   :  { %354 = vmatprep.subr.bf16.mxu0 %v521_v0  ;;  %374 = vmatprep.subr.bf16.mxu1 %v521_v0  ;;  %v407_v12 = vld [vmem:[#allocation6 + $0x38] sm:$0xff]   ;;  %v412_v14 = vld [vmem:[#allocation8 + $0x20] sm:$0xff]   ;;  %v413_v15 = vld [vmem:[#allocation8 + $0x28] sm:$0xff]   ;;  %p489_p10 = scmp.ne.s32.totalorder %s306_s29, %s488_s30  ;;  %p494_p12 = scmp.lt.s32.totalorder %s488_s30, %s488_s30 }
  0x3b   :  { %v64_v13 = vld [vmem:[#allocation3] sm:$0xf]  ;;  %v414_v16 = vld [vmem:[#allocation8 + $0x30] sm:$0xff]  }
  0x3c   :  { %v415_v17 = vld [vmem:[#allocation8 + $0x38] sm:$0xff]   ;;  %p495_p13 = por %p494_p12, %p493_p11 }
  0x3d   :  { %355 = vmatpush3.bf16.msra.mxu0 %v401_v2  ;;  %375 = vmatpush3.bf16.msra.mxu1 %v409_v6  ;;  %v323_v18 = vld [vmem:[%s611_s2] ss:$0 sm:$0xff]  ;;  %v324_v26 = vld [vmem:[%s611_s2 + $0x1] ss:$0 sm:$0xff] }
  0x3e   :  { %356 = vmatprep.subr.bf16.mxu0 %v521_v0  ;;  %376 = vmatprep.subr.bf16.mxu1 %v521_v0  ;;  %p496_p0 = pnand %p495_p13, %p489_p10 }
  0x41   :  { %357 = vmatpush3.bf16.msra.mxu0 %v402_v3  ;;  %377 = vmatpush3.bf16.msra.mxu1 %v410_v8 }
  0x42   :  { %358 = vmatprep.subr.bf16.mxu0 %v521_v0  ;;  %378 = vmatprep.subr.bf16.mxu1 %v521_v0 }
  0x45   :  { %359 = vmatpush3.bf16.msra.mxu0 %v403_v5  ;;  %379 = vmatpush3.bf16.msra.mxu1 %v411_v10 }
  0x46   :  { %360 = vmatprep.subr.bf16.mxu0 %v521_v0  ;;  %380 = vmatprep.subr.bf16.mxu1 %v521_v0 }
  0x49   :  { %361 = vmatpush3.bf16.msra.mxu0 %v404_v7  ;;  %381 = vmatpush3.bf16.msra.mxu1 %v412_v14 }
  0x4a   :  { %362 = vmatprep.subr.bf16.mxu0 %v521_v0  ;;  %382 = vmatprep.subr.bf16.mxu1 %v521_v0 }
  0x4d   :  { %363 = vmatpush3.bf16.msra.mxu0 %v405_v9  ;;  %383 = vmatpush3.bf16.msra.mxu1 %v413_v15 }
  0x4e   :  { %364 = vmatprep.subr.bf16.mxu0 %v521_v0  ;;  %384 = vmatprep.subr.bf16.mxu1 %v521_v0 }
  0x51   :  { %365 = vmatpush3.bf16.msra.mxu0 %v406_v11  ;;  %385 = vmatpush3.bf16.msra.mxu1 %v414_v16 }
  0x52   :  { %366 = vmatprep.subr.bf16.mxu0 %v521_v0  ;;  %386 = vmatprep.subr.bf16.mxu1 %v521_v0 }
  0x55   :  { %367 = vmatpush3.bf16.msra.mxu0 %v407_v12  ;;  %387 = vmatpush3.bf16.msra.mxu1 %v415_v17 }
  0x58   :  { %369 = vmatmul.mubr.bf16.vlgmr.msra.gmra.mrb[0].mxu0 %v64_v13 }
 0x12b   :  { %v163_v19 = vpop.f32.mrb[0].mxu0 }
 0x12c   :  { %v180_v20 = vadd.f32 %v323_v18, %v163_v19  ;;  %v370_v21 = vpop.f32.mrb[1].mxu0 }
 0x12d   :  { %v166_v22 = vpop.f32.mrb[2].mxu0 }
 0x12e   :  { %416 = vtanh.f32 %v180_v20  ;;  %v371_v23 = vpop.f32.mrb[3].mxu0 }
 0x138   :  { %v417_v24 = vpop.eup %416 }
 0x139   :  { %v182_v25 = vpack.c.bf16 %v417_v24, %v417_v24 }
 0x13b   :  { %389 = vmatmul.mubr.bf16.vlgmr.msra.gmra.mrb[0].mxu1 %v182_v25 }
 0x20e   :  { %v286_v27 = vpop.f32.mrb[0].mxu1 }
 0x20f   :  { %v287_v28 = vadd.f32 %v324_v26, %v286_v27  ;;  %v390_v29 = vpop.f32.mrb[1].mxu1 }
 0x210   :  { %v289_v30 = vpop.f32.mrb[2].mxu1 }
 0x211   :  { %v333_v31 = vmul.f32 -1.442695, %v287_v28  ;;  %v391_v32 = vpop.f32.mrb[3].mxu1 }
 0x213   :  { %418 = vpow2.f32 %v333_v31 }
 0x21d   :  { %v419_v33 = vpop.eup %418 }
 0x21e   :  { %v295_v34 = vadd.f32 1.0, %v419_v33 }
 0x220   :  { %420 = vrcp.f32 %v295_v34 }
 0x22a   :  { %v421_v35 = vpop.eup %420 }
 0x22b   :  { %298 = vst [vmem:[#allocation9] sm:$0xff] %v421_v35 }
 0x22c   :  { %499 = shalt.err (!%p496_p0)
}
 0x22d   :  { %s500_s6 = scalar_lea.hbm %s613_s4, 128 }
 0x22e   :  { %p501_p1 = scmp.ne.s32.totalorder %s613_s4, %s500_s6  ;;  %p504_p2 = scmp.lt.u32.totalorder %s500_s6, %s613_s4 }
 0x230   :  { %p506_p3 = pnand %p504_p2, %p501_p1 }
 0x232   :  { %509 = shalt.err (!%p506_p3)
}
 0x233   :  { %308 = dma.vmem_to_hbm [thread:$0]  %s306_s29, 128, %s613_s4, [#allocation5]  }
 0x234   :  { %514 = dma.done.wait [#allocation5], 128  }
 0x235   :  { %515 = vsyncadd [#allocation5], 4294967168 }
 0x236   :  { %312 = vsyncpa [#allocation4], 1 }
 0x237   :  { %313 = vsyncpa [#allocation7], 1 }
 0x238   :  { %314 = vsyncpa [#allocation5], 1 }

</bundles_post_ra>
